<compile_context>
chip_gen: v5e
topology: v5e:2x2
jax: 0.10.0
libtpu: 0.0.40
codegen_flags: <defaults>
</compile_context>

<pallas_src>
import functools

import jax
import jax.numpy as jnp
from jax.experimental import pallas as pl
from jax.experimental.pallas import tpu as pltpu


def _round_up(n, m):
    return ((n + m - 1) // m) * m


def _round_down(n, m):
    return (n // m) * m


# --------------------------------------------------------------------------- #
# Fast path: F | 128.  x is viewed (zero-copy) as (B // G, 128), G = 128 // F.
# --------------------------------------------------------------------------- #
def _packed_kernel(xr_ref, wexp_ref, b_ref, o_ref):
    """Packed-lane logistic regression tile.

    xr_ref  : (TR, 128)  packed rows; lane l = (local batch row l // F, feature l % F).
    wexp_ref: (128, G)   block-diagonal expanded weight, W_exp[g*F + f, g] = w[f].
    b_ref   : (1,) SMEM  bias.
    o_ref   : (TR, G)    probabilities; element [r, g] is batch row r*G + g.
    """
    logits = jnp.dot(xr_ref[...], wexp_ref[...],
                     preferred_element_type=jnp.float32)          # MXU, f32 accumulate
    o_ref[...] = jax.nn.sigmoid(logits + b_ref[0]).astype(o_ref.dtype)


def _forward_packed(x, w_vec, b_arr, target_block_bytes):
    B, F = x.shape
    G = 128 // F
    BR = B // G                                    # packed rows (>= 8 by routing)
    xr = x.reshape(BR, G * F)                      # zero-copy row-major regrouping

    # Block-diagonal expanded weight (128, G): column g carries w in rows g*F..g*F+F-1.
    eye = jnp.eye(G, dtype=w_vec.dtype)
    w_exp = (eye[:, None, :] * w_vec[None, :, None]).reshape(G * F, G).astype(x.dtype)

    itemsize = jnp.dtype(x.dtype).itemsize
    # ~target_block_bytes of x per grid step, in multiples of 8 sublanes.
    tr = max(8, _round_down(target_block_bytes // (128 * itemsize), 8))
    tr = min(tr, _round_up(BR, 8))
    if BR > 8:                                     # keep >= 2 grid steps (v7x megacore)
        tr = min(tr, _round_up(pl.cdiv(BR, 2), 8))
    grid = pl.cdiv(BR, tr)                         # last block may be partial; no x padding

    out = pl.pallas_call(
        _packed_kernel,
        out_shape=jax.ShapeDtypeStruct((BR, G), jnp.float32),
        grid=(grid,),
        in_specs=[
            pl.BlockSpec((tr, 128), lambda i: (i, 0)),           # streamed x tiles
            pl.BlockSpec((128, G), lambda i: (0, 0)),            # weight pinned in VMEM
            pl.BlockSpec(memory_space=pltpu.MemorySpace.SMEM),   # bias scalar in SMEM
        ],
        out_specs=pl.BlockSpec((tr, G), lambda i: (i, 0)),
        compiler_params=pltpu.CompilerParams(
            dimension_semantics=("parallel",),     # v7x: shard batch over its 2 TCs
            vmem_limit_bytes=32 << 20,             # headroom for larger target blocks
        ),
        cost_estimate=pl.CostEstimate(
            flops=2 * B * F,
            transcendentals=B,
            bytes_accessed=B * F * itemsize + 128 * G * itemsize + 4 + 4 * B,
        ),
    )(xr, w_exp, b_arr)

    return out.reshape(B, 1)                       # zero-copy; row-major == batch order


# --------------------------------------------------------------------------- #
# Generic fallback: any F / tiny batches.  Batch on sublanes, features on lanes.
# (For F ~ 16 this wastes lanes, so it is only used when the packed path cannot be.)
# --------------------------------------------------------------------------- #
def _rowwise_kernel(x_ref, w_ref, b_ref, o_ref):
    """x_ref: (TB, F); w_ref: (1, F); b_ref: (1,) SMEM; o_ref: (TB, 1).

    Compute in f32 (v5e VPU/EUP have no bf16).  For very large F an MXU dot would
    be preferable to the lane reduce, but such F always has the packed path or is
    compute-trivial at these sizes.
    """
    prod = x_ref[...].astype(jnp.float32) * w_ref[...].astype(jnp.float32)
    logits = jnp.sum(prod, axis=1, keepdims=True) + b_ref[0]
    o_ref[...] = jax.nn.sigmoid(logits).astype(o_ref.dtype)


def _forward_rowwise(x, w_vec, b_arr, target_block_bytes):
    B, F = x.shape
    w_row = w_vec.reshape(1, F)

    itemsize = jnp.dtype(x.dtype).itemsize
    lanes = _round_up(F, 128)                      # VMEM lane padding of the (TB, F) tile
    if B <= 8:
        tb = B                                     # single full-extent block
    else:
        tb = max(8, _round_down(target_block_bytes // (lanes * itemsize), 8))
        tb = min(tb, _round_up(pl.cdiv(B, 2), 8))  # keep >= 2 grid steps (v7x megacore)
    grid = pl.cdiv(B, tb)

    return pl.pallas_call(
        _rowwise_kernel,
        out_shape=jax.ShapeDtypeStruct((B, 1), jnp.float32),
        grid=(grid,),
        in_specs=[
            pl.BlockSpec((tb, F), lambda i: (i, 0)),
            pl.BlockSpec((1, F), lambda i: (0, 0)),
            pl.BlockSpec(memory_space=pltpu.MemorySpace.SMEM),
        ],
        out_specs=pl.BlockSpec((tb, 1), lambda i: (i, 0)),
        compiler_params=pltpu.CompilerParams(
            dimension_semantics=("parallel",),
            vmem_limit_bytes=32 << 20,
        ),
        cost_estimate=pl.CostEstimate(
            flops=2 * B * F,
            transcendentals=B,
            bytes_accessed=B * F * itemsize + F * itemsize + 4 + 4 * B,
        ),
    )(x, w_row, b_arr)


# --------------------------------------------------------------------------- #
# Public wrapper: SimpleLR.forward
# --------------------------------------------------------------------------- #
@functools.partial(jax.jit, static_argnames=("target_block_bytes",))
def simple_lr_forward(x, weight, bias, *, target_block_bytes=2 * 1024 * 1024):
    """sigmoid(x @ weight.T + bias).

    x      : (B, F) float32 or bfloat16.
    weight : torch nn.Linear(F, 1) weight, shape (1, F) (also accepts (F,) / (F, 1)).
    bias   : shape (1,) (also accepts any single-element shape).
    Returns (B, 1) float32 probabilities.
    """
    B, F = x.shape
    w_vec = jnp.asarray(weight).reshape(-1)
    if w_vec.shape[0] != F:
        raise ValueError(f"weight has {w_vec.shape[0]} elements, expected {F}")
    b_arr = jnp.asarray(bias, dtype=jnp.float32).reshape(-1)
    if b_arr.shape[0] != 1:
        raise ValueError("bias must have exactly one element")

    # Packed fast path needs F | 128, B divisible by the packing factor G = 128 // F,
    # and at least 8 packed rows (one native sublane tile).
    if 128 % F == 0 and B % (128 // F) == 0 and (B // (128 // F)) >= 8:
        return _forward_packed(x, w_vec, b_arr, target_block_bytes)
    # TODO(synk): batches with B % (128//F) != 0 take the generic (lane-padded) path;
    # a split main+tail dispatch would keep them on the packed path without copying x.
    return _forward_rowwise(x, w_vec, b_arr, target_block_bytes)


def reference_forward(x, weight, bias):
    w_row = jnp.asarray(weight).reshape(1, -1).astype(jnp.float32)
    b = jnp.asarray(bias, jnp.float32).reshape(1, 1)
    logits = jnp.sum(x.astype(jnp.float32) * w_row, axis=1, keepdims=True) + b
    return jax.nn.sigmoid(logits)


if __name__ == "__main__":
    key = jax.random.PRNGKey(0)
    # (batch, n_features): packed fast path with grid=1 and grid=2, plus the generic
    # fallback path (F does not divide 128).
    cases = [(64, 16), (256, 16), (32, 20)]
    for batch, n_features in cases:
        key, kx, kw, kb = jax.random.split(key, 4)
        x = jax.random.normal(kx, (batch, n_features), dtype=jnp.float32)
        # PyTorch stores nn.Linear(n_features, 1).weight as (1, F); pass that layout.
        weight = jax.random.normal(kw, (1, n_features), dtype=jnp.float32) * 0.1
        bias = jax.random.normal(kb, (1,), dtype=jnp.float32) * 0.1

        out = jax.block_until_ready(simple_lr_forward(x, weight, bias))
        ref = reference_forward(x, weight, bias)

        assert out.shape == (batch, 1), (out.shape, batch)
        assert jnp.allclose(out, ref, atol=2e-4, rtol=2e-4), (
            f"mismatch vs reference for shape ({batch}, {n_features})")

    print("KERNEL_OK")
</pallas_src>

<mosaic_0001>
module attributes {stable_mosaic.version = 11 : i64} {
  func.func @_packed_kernel(%arg0: i32, %arg1: memref<8x128xf32, #tpu.memory_space<vmem>>, %arg2: memref<128x8xf32, #tpu.memory_space<vmem>>, %arg3: memref<1xf32, #tpu.memory_space<smem>>, %arg4: memref<8x8xf32, #tpu.memory_space<vmem>>) attributes {dimension_semantics = [#tpu.dimension_semantics<parallel>], iteration_bounds = array<i64: 1>, scalar_prefetch = 0 : i64, scratch_operands = 0 : i64, tpu.core_type = #tpu.core_type<tc>, window_params = [{transform_indices = @transform_0, window_bounds = array<i64: 8, 128>}, {pipeline_mode = #tpu.pipeline_mode<synchronous>, transform_indices = @transform_1, window_bounds = array<i64: 128, 8>}, {transform_indices = @transform_2, window_bounds = array<i64: 1>}, {transform_indices = @transform_3, window_bounds = array<i64: 8, 8>}]} {
    %c0 = arith.constant 0 : index
    %c0_0 = arith.constant 0 : index
    %0 = vector.load %arg1[%c0, %c0_0] : memref<8x128xf32, #tpu.memory_space<vmem>>, vector<8x128xf32>
    %c0_1 = arith.constant 0 : index
    %c0_2 = arith.constant 0 : index
    %1 = vector.load %arg2[%c0_1, %c0_2] : memref<128x8xf32, #tpu.memory_space<vmem>>, vector<128x8xf32>
    %cst = arith.constant dense<0.000000e+00> : vector<8x8xf32>
    %2 = tpu.matmul %0, %1, %cst {dimension_numbers = #tpu.dot_dimension_numbers<[1], [0], [0], [1], [0, 0, 1, 1], [], []>} : vector<8x128xf32>, vector<128x8xf32>, vector<8x8xf32> -> vector<8x8xf32>
    %c0_3 = arith.constant 0 : index
    %3 = memref.load %arg3[%c0_3] : memref<1xf32, #tpu.memory_space<smem>>
    %4 = vector.broadcast %3 : f32 to vector<8x8xf32>
    %5 = arith.addf %2, %4 : vector<8x8xf32>
    %6 = arith.negf %5 : vector<8x8xf32>
    %7 = math.exp %6 : vector<8x8xf32>
    %cst_4 = arith.constant 1.000000e+00 : f32
    %8 = vector.broadcast %cst_4 : f32 to vector<8x8xf32>
    %9 = arith.addf %8, %7 : vector<8x8xf32>
    %10 = arith.divf %8, %9 : vector<8x8xf32>
    %c0_5 = arith.constant 0 : index
    %c0_6 = arith.constant 0 : index
    %11 = vector.load %arg4[%c0_5, %c0_6] : memref<8x8xf32, #tpu.memory_space<vmem>>, vector<8x8xf32>
    tpu.vector_store %arg4[%c0_5, %c0_6], %10 {strides = array<i32>} : memref<8x8xf32, #tpu.memory_space<vmem>>, vector<8x8xf32>,
    return
  }
  func.func @transform_0(%arg0: i32) -> (i32, i32) {
    %c0_i32 = arith.constant 0 : i32
    %c0_i32_0 = arith.constant 0 : i32
    return %arg0, %c0_i32 : i32, i32
  }
  func.func @transform_1(%arg0: i32) -> (i32, i32) {
    %c0_i32 = arith.constant 0 : i32
    %c0_i32_0 = arith.constant 0 : i32
    %c0_i32_1 = arith.constant 0 : i32
    return %c0_i32, %c0_i32_0 : i32, i32
  }
  func.func @transform_2(%arg0: i32) -> i32 {
    %c0_i32 = arith.constant 0 : i32
    %c0_i32_0 = arith.constant 0 : i32
    return %c0_i32 : i32
  }
  func.func @transform_3(%arg0: i32) -> (i32, i32) {
    %c0_i32 = arith.constant 0 : i32
    %c0_i32_0 = arith.constant 0 : i32
    return %arg0, %c0_i32 : i32, i32
  }
}

</mosaic_0001>

<bundles_post_ra>
// kernel: simple_lr_forward.1
= control target key start
LH: loop header
LB: loop body
LE: loop exit
PB: predicated region body
PF: predicated region fallthrough
CT: control target
= control target key end

     0   :  { %vm73_vm3 = vcmask 64512   ;;  %s161_s1 = inlined_call_operand.vmem [shape: f32[128,8], index: 1, kind: input, shape index: {}]   ;;  %s162_s0 = inlined_call_operand.vmem [shape: f32[8,128], index: 0, kind: input, shape index: {}]   ;;  %s163_s2 = inlined_call_operand.<no memory space> [shape: f32[1], index: 2, kind: input, shape index: {}]   ;;  %s164_s3 = inlined_call_operand.vmem [shape: f32[8,8], index: 3, kind: output, shape index: {}]  }
   0x1   :  { %v31_v0 = vld [vmem:[%s161_s1 + $0x78] sm:$0xff]  ;;  %v30_v1 = vld [vmem:[%s161_s1 + $0x70] sm:$0xff]  ;;  %v29_v2 = vld [vmem:[%s161_s1 + $0x68] sm:$0xff]  ;;  %v33_v17 = vstv %s163_s2 }
   0x2   :  { %34 = vmatpush.msra.mxu0 %v31_v0  ;;  %v28_v3 = vld [vmem:[%s161_s1 + $0x60] sm:$0xff]  ;;  %v27_v4 = vld [vmem:[%s161_s1 + $0x58] sm:$0xff]  ;;  %v26_v5 = vld [vmem:[%s161_s1 + $0x50] sm:$0xff] }
   0x3   :  { %v25_v6 = vld [vmem:[%s161_s1 + $0x48] sm:$0xff]  ;;  %v24_v7 = vld [vmem:[%s161_s1 + $0x40] sm:$0xff]  ;;  %v23_v8 = vld [vmem:[%s161_s1 + $0x38] sm:$0xff] }
   0x4   :  { %35 = vmatpush.msra.mxu0 %v30_v1  ;;  %v22_v9 = vld [vmem:[%s161_s1 + $0x30] sm:$0xff]  ;;  %v21_v10 = vld [vmem:[%s161_s1 + $0x28] sm:$0xff]  ;;  %v20_v11 = vld [vmem:[%s161_s1 + $0x20] sm:$0xff] }
   0x5   :  { %v19_v12 = vld [vmem:[%s161_s1 + $0x18] sm:$0xff]  ;;  %v18_v13 = vld [vmem:[%s161_s1 + $0x10] sm:$0xff]  ;;  %v17_v14 = vld [vmem:[%s161_s1 + $0x8] sm:$0xff] }
   0x6   :  { %36 = vmatpush.msra.mxu0 %v29_v2  ;;  %v16_v15 = vld [vmem:[%s161_s1] sm:$0xff] }
   0x7   :  { %v15_v16 = vld [vmem:[%s162_s0] sm:$0xff] }
   0x8   :  { %37 = vmatpush.msra.mxu0 %v28_v3 }
   0xa   :  { %38 = vmatpush.msra.mxu0 %v27_v4 }
   0xc   :  { %39 = vmatpush.msra.mxu0 %v26_v5 }
   0xe   :  { %40 = vmatpush.msra.mxu0 %v25_v6 }
  0x10   :  { %41 = vmatpush.msra.mxu0 %v24_v7 }
  0x12   :  { %42 = vmatpush.msra.mxu0 %v23_v8 }
  0x14   :  { %43 = vmatpush.msra.mxu0 %v22_v9 }
  0x16   :  { %44 = vmatpush.msra.mxu0 %v21_v10 }
  0x18   :  { %45 = vmatpush.msra.mxu0 %v20_v11 }
  0x1a   :  { %46 = vmatpush.msra.mxu0 %v19_v12 }
  0x1c   :  { %47 = vmatpush.msra.mxu0 %v18_v13 }
  0x1e   :  { %48 = vmatpush.msra.mxu0 %v17_v14 }
  0x20   :  { %49 = vmatpush.msra.mxu0 %v16_v15 }
  0x21   :  { %50 = vmatmul.f32.vlgmr.msra.gmra.mxu0 %v15_v16 }
  0x9e   :  { %v51_v18 = vpop.f32.mrf.mxu0 }
  0x9f   :  { %v52_v19 = vadd.f32 %v51_v18, %v33_v17 }
  0xa1   :  { %v79_v20 = vmul.f32 -1.442695, %v52_v19 }
  0xa3   :  { %80 = vpow2.f32 %v79_v20 }
  0xa9   :  { %v81_v21 = vpop.eup %80 }
  0xaa   :  { %v57_v22 = vadd.f32 1.0, %v81_v21 }
  0xac   :  { %82 = vrcp.f32 %v57_v22  ;;  %v69_v26 = vand.u32 2147483648, %v57_v22  ;;  %v67_v28 = vand.u32 2147483647, %v57_v22  ;;  %vm63_vm1 = vweird.f32 %v57_v22 }
  0xae   :  { %v70_v30 = vor.u32 1.1754944e-38, %v69_v26  ;;  %vm68_vm4 = vcmp.eq.f32.partialorder %v67_v28, 8.507059e+37 }
  0xb2   :  { %v83_v23 = vpop.eup %82 }
  0xb3   :  { %v59_v24 = vmul.f32 %v83_v23, %v57_v22  ;;  %vm64_vm0 = vweird.f32 %v83_v23 }
  0xb4   :  { %vm65_vm2 = vmor %vm63_vm1, %vm64_vm0 }
  0xb5   :  { %v60_v25 = vsub.f32 1.0, %v59_v24 }
  0xb7   :  { %v61_v27 = vmul.f32 %v83_v23, %v60_v25 }
  0xb9   :  { %v62_v29 = vadd.f32 %v83_v23, %v61_v27 }
  0xbb   :  { %v66_v31 = vsel %vm65_vm2, %v83_v23, %v62_v29 }
  0xbc   :  { %v71_v32 = vsel %vm68_vm4, %v70_v30, %v66_v31 }
  0xbd   :  { %74 = vst.msk [vmem:[%s164_s3] sm:$0xff] %vm73_vm3, %v71_v32 }

</bundles_post_ra>
